<compile_context>
chip_gen: v7x
topology: tpu7x:2x2x1
jax: 0.10.0
libtpu: 0.0.40
codegen_flags: <defaults>
</compile_context>

<pallas_src>
import math

import jax
import jax.numpy as jnp
from jax.experimental import pallas as pl
from jax.experimental.pallas import tpu as pltpu

_MAX_BLOCK_BYTES = 4 << 20      # ~4 MiB per block
_VMEM_LIMIT_BYTES = 32 << 20    # explicit scoped-VMEM limit (safe on v5e/v6e/v7x)


def _cdiv(a, b):
    return -(-a // b)


def _mish_kernel(x_ref, o_ref):
    x = x_ref[...].astype(jnp.float32)
    # tanh(softplus(x)) = ((1+e^x)^2 - 1) / ((1+e^x)^2 + 1)
    # with t = e^x:  num = t*(2+t),  den = num + 2   (cancellation-free).
    # Clamp at x=20: t^2 ~ 2.4e17 (finite), num/den == 1.0 in f32, which equals
    # tanh(softplus(x)) to f32 precision for all x > 20 -> no select needed.
    t = jnp.exp(jnp.minimum(x, 20.0))
    num = t * (2.0 + t)
    tanh_sp = num / (num + 2.0)
    o_ref[...] = (x * tanh_sp).astype(o_ref.dtype)


def mish(x):
    """Elementwise Mish for an arbitrary-shaped array via one pallas_call."""
    orig_shape = x.shape
    dtype = x.dtype
    total = math.prod(orig_shape)
    if total == 0:
        return x

    itemsize = jnp.dtype(dtype).itemsize
    pack = 32 // itemsize            # sublane pack: 8 (f32), 16 (bf16), 32 (int8)

    flat = jnp.reshape(x, (-1,))     # free bitcast for contiguous row-major

    # Lane width: largest multiple of 128 (<=1024) that divides the size, so no
    # wrapper-side padding pass is needed for those shapes.
    lanes = 0
    for cand in (1024, 512, 256, 128):
        if total % cand == 0:
            lanes = cand
            break
    padded_total = total
    if lanes == 0:
        # Rare ragged case (size not a multiple of 128): pad up to 128.
        # TODO(synk): handle this fully in-kernel with a masked tail store to
        # avoid the extra HBM pass from jnp.pad / the final slice.
        lanes = 128
        padded_total = 128 * _cdiv(total, 128)
        flat = jnp.pad(flat, (0, padded_total - total))

    rows = padded_total // lanes

    # Row tile: ~4 MiB blocks, multiple of the dtype sublane pack.
    target_rows = max(pack, _MAX_BLOCK_BYTES // (lanes * itemsize))
    target_rows = pack * max(1, target_rows // pack)
    if rows <= pack:
        tr = rows                               # block == full dim (tiny tensors)
    else:
        tr = min(target_rows, pack * (rows // pack))
        if _cdiv(rows, tr) == 1:
            # Keep >=2 grid steps so both v7x TensorCores get work.
            tr = max(pack, pack * _cdiv(_cdiv(rows, 2), pack))

    grid = (_cdiv(rows, tr),)

    x2d = flat.reshape(rows, lanes)
    out2d = pl.pallas_call(
        _mish_kernel,
        out_shape=jax.ShapeDtypeStruct((rows, lanes), dtype),
        grid=grid,
        in_specs=[pl.BlockSpec((tr, lanes), lambda i: (i, 0))],
        out_specs=pl.BlockSpec((tr, lanes), lambda i: (i, 0)),
        compiler_params=pltpu.CompilerParams(
            dimension_semantics=("parallel",),
            vmem_limit_bytes=_VMEM_LIMIT_BYTES),
    )(x2d)

    out_flat = out2d.reshape(-1)
    if padded_total != total:
        out_flat = out_flat[:total]
    return out_flat.reshape(orig_shape)


if __name__ == "__main__":
    key = jax.random.PRNGKey(0)
    x = 4.0 * jax.random.normal(key, (2, 4, 16, 16), jnp.float32)

    out = jax.jit(mish)(x)
    jax.block_until_ready(out)
    assert out.shape == x.shape, out.shape

    # Reference: exact Mish in plain JAX.
    ref = x * jnp.tanh(jax.nn.softplus(x))
    rel_err = jnp.max(jnp.abs(out - ref) / (1.0 + jnp.abs(ref)))
    assert jnp.isfinite(rel_err) and float(rel_err) < 1e-5, float(rel_err)

    print("KERNEL_OK")
</pallas_src>

<mosaic_0001>
module attributes {stable_mosaic.version = 11 : i64} {
  func.func @_mish_kernel(%arg0: i32, %arg1: memref<2x1024xf32, #tpu.memory_space<vmem>>, %arg2: memref<2x1024xf32, #tpu.memory_space<vmem>>) attributes {dimension_semantics = [#tpu.dimension_semantics<parallel>], iteration_bounds = array<i64: 1>, scalar_prefetch = 0 : i64, scratch_operands = 0 : i64, tpu.core_type = #tpu.core_type<tc>, window_params = [{transform_indices = @transform_0, window_bounds = array<i64: 2, 1024>}, {transform_indices = @transform_1, window_bounds = array<i64: 2, 1024>}]} {
    %c0 = arith.constant 0 : index
    %c0_0 = arith.constant 0 : index
    %0 = vector.load %arg1[%c0, %c0_0] : memref<2x1024xf32, #tpu.memory_space<vmem>>, vector<2x1024xf32>
    %cst = arith.constant 2.000000e+01 : f32
    %1 = vector.broadcast %cst : f32 to vector<2x1024xf32>
    %2 = arith.minimumf %0, %1 : vector<2x1024xf32>
    %3 = math.exp %2 : vector<2x1024xf32>
    %cst_1 = arith.constant 2.000000e+00 : f32
    %4 = vector.broadcast %cst_1 : f32 to vector<2x1024xf32>
    %5 = arith.addf %4, %3 : vector<2x1024xf32>
    %6 = arith.mulf %3, %5 : vector<2x1024xf32>
    %cst_2 = arith.constant 2.000000e+00 : f32
    %7 = vector.broadcast %cst_2 : f32 to vector<2x1024xf32>
    %8 = arith.addf %6, %7 : vector<2x1024xf32>
    %9 = arith.divf %6, %8 : vector<2x1024xf32>
    %10 = arith.mulf %0, %9 : vector<2x1024xf32>
    %c0_3 = arith.constant 0 : index
    %c0_4 = arith.constant 0 : index
    %11 = vector.load %arg2[%c0_3, %c0_4] : memref<2x1024xf32, #tpu.memory_space<vmem>>, vector<2x1024xf32>
    tpu.vector_store %arg2[%c0_3, %c0_4], %10 {strides = array<i32>} : memref<2x1024xf32, #tpu.memory_space<vmem>>, vector<2x1024xf32>,
    return
  }
  func.func @transform_0(%arg0: i32) -> (i32, i32) {
    %c0_i32 = arith.constant 0 : i32
    %c0_i32_0 = arith.constant 0 : i32
    return %arg0, %c0_i32 : i32, i32
  }
  func.func @transform_1(%arg0: i32) -> (i32, i32) {
    %c0_i32 = arith.constant 0 : i32
    %c0_i32_0 = arith.constant 0 : i32
    return %arg0, %c0_i32 : i32, i32
  }
}

</mosaic_0001>

<bundles_post_ra>
// kernel: mish.1
= control target key start
LH: loop header
LB: loop body
LE: loop exit
PB: predicated region body
PF: predicated region fallthrough
CT: control target
= control target key end

     0   :  { %s64_s0 = inlined_call_operand.vmem [shape: f32[2,1024], index: 0, kind: input, shape index: {}]   ;;  %s65_s1 = inlined_call_operand.vmem [shape: f32[2,1024], index: 1, kind: output, shape index: {}]  }
   0x1   :  { %v8_v0 = vld [vmem:[%s64_s0] sm:$0xff]  ;;  %v9_v1 = vld [vmem:[%s64_s0 + $0x8] sm:$0xff] }
   0x2   :  { %v10_v2 = vmin.f32 %v8_v0, 20.0  ;;  %v11_v3 = vmin.f32 %v9_v1, 20.0 }
   0x4   :  { %v12_v4 = vmul.f32 1.442695, %v10_v2  ;;  %v14_v5 = vmul.f32 1.442695, %v11_v3 }
   0x6   :  { %34 = vpow2.f32 %v12_v4 }
   0x7   :  { %36 = vpow2.f32 %v14_v5 }
  0x10   :  { %v35_v6 = vpop.eup %34 }
  0x11   :  { %v37_v7 = vpop.eup %36  ;;  %v16_v8 = vadd.f32 2.0, %v35_v6 }
  0x12   :  { %v17_v9 = vadd.f32 2.0, %v37_v7 }
  0x13   :  { %v18_v10 = vmul.f32 %v35_v6, %v16_v8 }
  0x14   :  { %v19_v11 = vmul.f32 %v37_v7, %v17_v9 }
  0x15   :  { %v20_v12 = vadd.f32 2.0, %v18_v10 }
  0x16   :  { %v21_v13 = vadd.f32 2.0, %v19_v11 }
  0x17   :  { %38 = vrcp.f32 %v20_v12 }
  0x18   :  { %40 = vrcp.f32 %v21_v13 }
  0x21   :  { %v39_v14 = vpop.eup %38 }
  0x22   :  { %v41_v15 = vpop.eup %40  ;;  %v23_v16 = vmul.f32 %v39_v14, %v18_v10 }
  0x23   :  { %v25_v17 = vmul.f32 %v41_v15, %v19_v11 }
  0x24   :  { %v26_v18 = vmul.f32 %v23_v16, %v8_v0 }
  0x25   :  { %v27_v19 = vmul.f32 %v25_v17, %v9_v1 }
  0x26   :  { %28 = vst [vmem:[%s65_s1] sm:$0xff] %v26_v18 }
  0x27   :  { %29 = vst [vmem:[%s65_s1 + $0x8] sm:$0xff] %v27_v19 }

</bundles_post_ra>
